<compile_context>
chip_gen: v6e
topology: v6e:2x2x1
jax: 0.10.0
libtpu: 0.0.40
codegen_flags: <defaults>
</compile_context>

<pallas_src>
import jax
import jax.numpy as jnp
from jax import lax
from jax.experimental import pallas as pl
from jax.experimental.pallas import tpu as pltpu


def _round_up(x, m):
    return ((x + m - 1) // m) * m


def _make_lse_kernel(tile_j, mask_cols, resident):
    """Online-logsumexp kernel over pre-normalized, pre-scaled operands.

    Grid = (row_tiles, col_tiles). Columns are the reduction ("arbitrary")
    axis; m/l scratch carry the online LSE state across a column sweep.
    """

    def body(fea_ref, html_ref, bias_ref, out_ref, m_scr, l_scr):
        j = pl.program_id(1)
        last_j = pl.num_programs(1) - 1

        @pl.when(j == 0)
        def _init():
            m_scr[...] = jnp.full(m_scr.shape, -jnp.inf, dtype=jnp.float32)
            l_scr[...] = jnp.zeros(l_scr.shape, dtype=jnp.float32)

        if resident:
            # html is a single VMEM-resident block; slice the j-th column tile.
            col0 = pl.multiple_of(j * tile_j, tile_j)
            html_blk = html_ref[pl.ds(col0, tile_j), :]
        else:
            html_blk = html_ref[...]

        # sim tile = fea_n @ html_n^T (contract last dims; no explicit transpose).
        s = lax.dot_general(
            fea_ref[...], html_blk,
            dimension_numbers=(((1,), (1,)), ((), ())),
            preferred_element_type=jnp.float32)

        if mask_cols:
            # (1, tile_j) additive bias: 0 on valid columns, -1e30 on padding.
            s = s + bias_ref[...]

        # Online logsumexp update.
        m_prev = m_scr[...]
        m_new = jnp.maximum(m_prev, jnp.max(s, axis=-1, keepdims=True))
        alpha = jnp.exp(m_prev - m_new)
        l_scr[...] = alpha * l_scr[...] + jnp.sum(
            jnp.exp(s - m_new), axis=-1, keepdims=True)
        m_scr[...] = m_new

        @pl.when(j == last_j)
        def _finalize():
            out_ref[...] = jnp.log(l_scr[...]) + m_scr[...]

    if mask_cols:
        return body

    def body_nomask(fea_ref, html_ref, out_ref, m_scr, l_scr):
        return body(fea_ref, html_ref, None, out_ref, m_scr, l_scr)

    return body_nomask


def infonce_loss(fea, hidden_html, temperature, matmul_dtype=jnp.bfloat16):
    """Pallas implementation of InfoNCELoss.forward.

    Args:
      fea:          (num_rois, d_model) float array.
      hidden_html:  (num_rois, d_model) float array.
      temperature:  python float (config.temperature).
      matmul_dtype: dtype of the MXU operands (bf16 default; f32 for exactness).

    Returns:
      scalar float32 loss.
    """
    assert fea.ndim == 2 and fea.shape == hidden_html.shape
    n, d = fea.shape
    inv_temp = 1.0 / float(temperature)

    op_dtype = jnp.dtype(matmul_dtype)
    op_itemsize = op_dtype.itemsize
    is_bf16 = op_dtype == jnp.dtype(jnp.bfloat16)

    # --- Hoisted normalization (once, in the wrapper). 1/T folded into fea. ---
    fea32 = fea.astype(jnp.float32)
    html32 = hidden_html.astype(jnp.float32)
    fea_n = fea32 * (lax.rsqrt(
        jnp.maximum(jnp.sum(fea32 * fea32, axis=-1, keepdims=True), 1e-24))
        * inv_temp)
    html_n = html32 * lax.rsqrt(
        jnp.maximum(jnp.sum(html32 * html32, axis=-1, keepdims=True), 1e-24))

    fea_op = fea_n.astype(op_dtype)
    html_op = html_n.astype(op_dtype)

    # Diagonal term (sim[i, i], with 1/T folded), computed from the exact
    # operands the kernel's MXU sees. O(N*d), no third input stream needed.
    diag = jnp.sum(fea_op.astype(jnp.float32) * html_op.astype(jnp.float32),
                   axis=-1)

    # --- Tiling: decoupled row/column tiles. ---
    sub = 16 if is_bf16 else 8  # bf16 packs 16 sublanes/vreg
    if n <= 256:
        tile_i = _round_up(n, sub)
    elif n <= 1024:
        tile_i = 256
    else:
        tile_i = 512
    if n <= 256:
        tile_j = _round_up(n, sub)
    else:
        tile_j = 256

    n_pad_i = _round_up(n, tile_i)
    n_pad_j = _round_up(n, tile_j)

    fea_p = jnp.pad(fea_op, ((0, n_pad_i - n), (0, 0))) if n_pad_i != n else fea_op
    html_p = jnp.pad(html_op, ((0, n_pad_j - n), (0, 0))) if n_pad_j != n else html_op
    mask_cols = n_pad_j != n

    num_row_tiles = n_pad_i // tile_i
    num_col_tiles = n_pad_j // tile_j
    grid = (num_row_tiles, num_col_tiles)

    # Keep normalized html fully VMEM-resident when it (double-buffered) fits
    # comfortably even on v7x's 64 MiB VMEM; otherwise stream column tiles.
    resident = (num_col_tiles > 1) and (n_pad_j * d * op_itemsize <= (12 << 20))

    kernel = _make_lse_kernel(tile_j, mask_cols, resident)

    in_specs = [pl.BlockSpec((tile_i, d), lambda i, j: (i, 0))]   # fea row tile
    if resident:
        in_specs.append(pl.BlockSpec((n_pad_j, d), lambda i, j: (0, 0)))  # whole html
    else:
        in_specs.append(pl.BlockSpec((tile_j, d), lambda i, j: (j, 0)))   # html col tile
    inputs = [fea_p, html_p]
    if mask_cols:
        col_ids = jnp.arange(n_pad_j, dtype=jnp.int32)
        bias = jnp.where(col_ids < n, 0.0, -1e30).astype(jnp.float32)[None, :]
        in_specs.append(pl.BlockSpec((1, tile_j), lambda i, j: (0, j)))
        inputs.append(bias)

    # --- VMEM budget / cost estimate. ---
    html_rows_in_vmem = n_pad_j if resident else tile_j
    vmem_need = (
        2 * tile_i * d * op_itemsize            # fea tile, double-buffered
        + 2 * html_rows_in_vmem * d * op_itemsize  # html (resident or tile)
        + 4 * tile_i * tile_j * 4               # s-tile / exp temporaries headroom
        + 6 * tile_i * 4                        # out + m/l scratch
        + (2 * tile_j * 4 if mask_cols else 0))
    vmem_limit = int(min(max(int(vmem_need * 1.25), 32 << 20), 64 << 20))

    html_streams = 1 if resident else num_row_tiles
    cost = pl.CostEstimate(
        flops=2 * n_pad_i * n_pad_j * d,
        transcendentals=n_pad_i * n_pad_j,
        bytes_accessed=(n_pad_i * d * op_itemsize
                        + html_streams * n_pad_j * d * op_itemsize
                        + n_pad_i * 4),
    )

    lse = pl.pallas_call(
        kernel,
        out_shape=jax.ShapeDtypeStruct((n_pad_i, 1), jnp.float32),
        grid_spec=pltpu.PrefetchScalarGridSpec(
            num_scalar_prefetch=0,
            grid=grid,
            in_specs=in_specs,
            out_specs=pl.BlockSpec((tile_i, 1), lambda i, j: (i, 0)),
            scratch_shapes=[
                pltpu.VMEM((tile_i, 1), jnp.float32),  # running max m
                pltpu.VMEM((tile_i, 1), jnp.float32),  # running sum l
            ],
        ),
        compiler_params=pltpu.CompilerParams(
            dimension_semantics=("parallel", "arbitrary"),
            vmem_limit_bytes=vmem_limit,
        ),
        cost_estimate=cost,
    )(*inputs)

    # Mean over the real rows (padded rows excluded); trivial JAX reduce.
    return jnp.mean(lse[:n, 0] - diag)


def _reference_infonce(fea, hidden_html, temperature):
    """Pure-JAX reference mirroring the PyTorch forward."""
    fea = fea.astype(jnp.float32)
    hidden_html = hidden_html.astype(jnp.float32)
    fea_n = fea / jnp.maximum(jnp.linalg.norm(fea, axis=-1, keepdims=True), 1e-12)
    html_n = hidden_html / jnp.maximum(
        jnp.linalg.norm(hidden_html, axis=-1, keepdims=True), 1e-12)
    sim = (fea_n @ html_n.T) / temperature
    lse = jax.nn.logsumexp(sim, axis=-1)
    diag = jnp.diagonal(sim)
    return jnp.mean(lse - diag)


if __name__ == "__main__":
    temperature = 0.07
    key = jax.random.PRNGKey(0)
    k1, k2, k3, k4 = jax.random.split(key, 4)

    # Primary small test consistent with the module: (num_rois, d_model).
    num_rois, d_model = 8, 32
    fea = jax.random.normal(k1, (num_rois, d_model), dtype=jnp.float32)
    hidden_html = jax.random.normal(k2, (num_rois, d_model), dtype=jnp.float32)
    ref = _reference_infonce(fea, hidden_html, temperature)

    # f32-operand path: tight tolerance against the reference.
    loss_f32 = jax.block_until_ready(
        infonce_loss(fea, hidden_html, temperature, matmul_dtype=jnp.float32))
    assert jnp.allclose(loss_f32, ref, rtol=1e-4, atol=1e-4), (loss_f32, ref)

    # Default bf16-operand path (perf default): looser tolerance.
    loss_bf16 = jax.block_until_ready(infonce_loss(fea, hidden_html, temperature))
    assert jnp.allclose(loss_bf16, ref, rtol=5e-2, atol=5e-2), (loss_bf16, ref)

    # N not a multiple of the sublane tile exercises the padding/bias-mask path.
    n2, d2 = 13, 32
    fea2 = jax.random.normal(k3, (n2, d2), dtype=jnp.float32)
    html2 = jax.random.normal(k4, (n2, d2), dtype=jnp.float32)
    ref2 = _reference_infonce(fea2, html2, temperature)
    loss2 = jax.block_until_ready(
        infonce_loss(fea2, html2, temperature, matmul_dtype=jnp.float32))
    assert jnp.allclose(loss2, ref2, rtol=1e-4, atol=1e-4), (loss2, ref2)

    print("KERNEL_OK")
</pallas_src>

<mosaic_0001>
module attributes {stable_mosaic.version = 11 : i64} {
  func.func @body_nomask(%arg0: i32, %arg1: i32, %arg2: memref<8x32xf32, #tpu.memory_space<vmem>>, %arg3: memref<8x32xf32, #tpu.memory_space<vmem>>, %arg4: memref<8x1xf32, #tpu.memory_space<vmem>>, %arg5: memref<8x1xf32, #tpu.memory_space<vmem>>, %arg6: memref<8x1xf32, #tpu.memory_space<vmem>>) attributes {dimension_semantics = [#tpu.dimension_semantics<parallel>, #tpu.dimension_semantics<arbitrary>], iteration_bounds = array<i64: 1, 1>, scalar_prefetch = 0 : i64, scratch_operands = 2 : i64, tpu.core_type = #tpu.core_type<tc>, window_params = [{transform_indices = @transform_0, window_bounds = array<i64: 8, 32>}, {transform_indices = @transform_1, window_bounds = array<i64: 8, 32>}, {transform_indices = @transform_2, window_bounds = array<i64: 8, 1>}]} {
    %c0_i32 = arith.constant 0 : i32
    %0 = arith.cmpi eq, %arg1, %c0_i32 : i32
    %1 = arith.extui %0 : i1 to i32
    %c0_i32_0 = arith.constant 0 : i32
    %2 = arith.cmpi ne, %1, %c0_i32_0 : i32
    scf.if %2 {
      %cst_16 = arith.constant 0xFF800000 : f32
      %25 = vector.broadcast %cst_16 : f32 to vector<8x1xf32>
      %c0_17 = arith.constant 0 : index
      %c0_18 = arith.constant 0 : index
      %26 = vector.load %arg5[%c0_17, %c0_18] : memref<8x1xf32, #tpu.memory_space<vmem>>, vector<8x1xf32>
      tpu.vector_store %arg5[%c0_17, %c0_18], %25 {strides = array<i32>} : memref<8x1xf32, #tpu.memory_space<vmem>>, vector<8x1xf32>,
      %cst_19 = arith.constant 0.000000e+00 : f32
      %27 = vector.broadcast %cst_19 : f32 to vector<8x1xf32>
      %c0_20 = arith.constant 0 : index
      %c0_21 = arith.constant 0 : index
      %28 = vector.load %arg6[%c0_20, %c0_21] : memref<8x1xf32, #tpu.memory_space<vmem>>, vector<8x1xf32>
      tpu.vector_store %arg6[%c0_20, %c0_21], %27 {strides = array<i32>} : memref<8x1xf32, #tpu.memory_space<vmem>>, vector<8x1xf32>,
    } else {
    }
    %c0 = arith.constant 0 : index
    %c0_1 = arith.constant 0 : index
    %3 = vector.load %arg3[%c0, %c0_1] : memref<8x32xf32, #tpu.memory_space<vmem>>, vector<8x32xf32>
    %c0_2 = arith.constant 0 : index
    %c0_3 = arith.constant 0 : index
    %4 = vector.load %arg2[%c0_2, %c0_3] : memref<8x32xf32, #tpu.memory_space<vmem>>, vector<8x32xf32>
    %cst = arith.constant dense<0.000000e+00> : vector<8x8xf32>
    %5 = tpu.matmul %4, %3, %cst {dimension_numbers = #tpu.dot_dimension_numbers<[1], [1], [0], [0], [0, 0, 1, 0], [], []>} : vector<8x32xf32>, vector<8x32xf32>, vector<8x8xf32> -> vector<8x8xf32>
    %c0_4 = arith.constant 0 : index
    %c0_5 = arith.constant 0 : index
    %6 = vector.load %arg5[%c0_4, %c0_5] : memref<8x1xf32, #tpu.memory_space<vmem>>, vector<8x1xf32>
    %cst_6 = arith.constant dense<0xFF800000> : vector<8xf32>
    %7 = vector.multi_reduction <maximumf>, %5, %cst_6 [1] : vector<8x8xf32> to vector<8xf32>
    %8 = vector.shape_cast %7 : vector<8xf32> to vector<8x1xf32>
    %9 = arith.maximumf %6, %8 : vector<8x1xf32>
    %10 = arith.subf %6, %9 : vector<8x1xf32>
    %11 = math.exp %10 : vector<8x1xf32>
    %c0_7 = arith.constant 0 : index
    %c0_8 = arith.constant 0 : index
    %12 = vector.load %arg6[%c0_7, %c0_8] : memref<8x1xf32, #tpu.memory_space<vmem>>, vector<8x1xf32>
    %13 = arith.mulf %11, %12 : vector<8x1xf32>
    %14 = vector.broadcast %9 : vector<8x1xf32> to vector<8x8xf32>
    %15 = arith.subf %5, %14 : vector<8x8xf32>
    %16 = math.exp %15 : vector<8x8xf32>
    %cst_9 = arith.constant dense<0.000000e+00> : vector<8xf32>
    %17 = vector.multi_reduction <add>, %16, %cst_9 [1] : vector<8x8xf32> to vector<8xf32>
    %18 = vector.shape_cast %17 : vector<8xf32> to vector<8x1xf32>
    %19 = arith.addf %13, %18 : vector<8x1xf32>
    %c0_10 = arith.constant 0 : index
    %c0_11 = arith.constant 0 : index
    %20 = vector.load %arg6[%c0_10, %c0_11] : memref<8x1xf32, #tpu.memory_space<vmem>>, vector<8x1xf32>
    tpu.vector_store %arg6[%c0_10, %c0_11], %19 {strides = array<i32>} : memref<8x1xf32, #tpu.memory_space<vmem>>, vector<8x1xf32>,
    %c0_12 = arith.constant 0 : index
    %c0_13 = arith.constant 0 : index
    %21 = vector.load %arg5[%c0_12, %c0_13] : memref<8x1xf32, #tpu.memory_space<vmem>>, vector<8x1xf32>
    tpu.vector_store %arg5[%c0_12, %c0_13], %9 {strides = array<i32>} : memref<8x1xf32, #tpu.memory_space<vmem>>, vector<8x1xf32>,
    %c0_i32_14 = arith.constant 0 : i32
    %22 = arith.cmpi eq, %arg1, %c0_i32_14 : i32
    %23 = arith.extui %22 : i1 to i32
    %c0_i32_15 = arith.constant 0 : i32
    %24 = arith.cmpi ne, %23, %c0_i32_15 : i32
    scf.if %24 {
      %c0_16 = arith.constant 0 : index
      %c0_17 = arith.constant 0 : index
      %25 = vector.load %arg6[%c0_16, %c0_17] : memref<8x1xf32, #tpu.memory_space<vmem>>, vector<8x1xf32>
      %26 = math.log %25 : vector<8x1xf32>
      %c0_18 = arith.constant 0 : index
      %c0_19 = arith.constant 0 : index
      %27 = vector.load %arg5[%c0_18, %c0_19] : memref<8x1xf32, #tpu.memory_space<vmem>>, vector<8x1xf32>
      %28 = arith.addf %26, %27 : vector<8x1xf32>
      %c0_20 = arith.constant 0 : index
      %c0_21 = arith.constant 0 : index
      %29 = vector.load %arg4[%c0_20, %c0_21] : memref<8x1xf32, #tpu.memory_space<vmem>>, vector<8x1xf32>
      tpu.vector_store %arg4[%c0_20, %c0_21], %28 {strides = array<i32>} : memref<8x1xf32, #tpu.memory_space<vmem>>, vector<8x1xf32>,
    } else {
    }
    return
  }
  func.func @transform_0(%arg0: i32, %arg1: i32) -> (i32, i32) {
    %c0_i32 = arith.constant 0 : i32
    %c0_i32_0 = arith.constant 0 : i32
    return %arg0, %c0_i32 : i32, i32
  }
  func.func @transform_1(%arg0: i32, %arg1: i32) -> (i32, i32) {
    %c0_i32 = arith.constant 0 : i32
    %c0_i32_0 = arith.constant 0 : i32
    return %arg1, %c0_i32 : i32, i32
  }
  func.func @transform_2(%arg0: i32, %arg1: i32) -> (i32, i32) {
    %c0_i32 = arith.constant 0 : i32
    %c0_i32_0 = arith.constant 0 : i32
    return %arg0, %c0_i32 : i32, i32
  }
}

</mosaic_0001>

<bundles_post_ra>
// kernel: tpu_custom_call.1
= control target key start
LH: loop header
LB: loop body
LE: loop exit
PB: predicated region body
PF: predicated region fallthrough
CT: control target
= control target key end

     0   :  { %7 = vsyncpa [#allocation5], 0  ;;  %s265_s0 = inlined_call_operand.hbm [shape: f32[8,32], index: 0, kind: input, shape index: {}]   ;;  %s266_s1 = inlined_call_operand.hbm [shape: f32[8,32], index: 1, kind: input, shape index: {}]   ;;  %s267_s2 = inlined_call_operand.vmem [shape: f32[8,1], index: 2, kind: output, shape index: {}]  }
   0x1   :  { %8 = vsyncpa [#allocation7], 0  ;;  %s228_s9 = smov [#allocation4]   ;;  %s229_s11 = smov [#allocation6]  }
   0x2   :  { %s15_s10 = sshll.u32 %s228_s9, 4  ;;  %s25_s12 = sshll.u32 %s229_s11, 4  ;;  %s16_s10 = int_to_ptr.vmem [resolvable:$true] %s15_s10  ;;  %s26_s12 = int_to_ptr.vmem [resolvable:$true] %s25_s12 }
   0x3   :  { %s192_s13 = scalar_lea.vmem %s16_s10, 128  ;;  %p197_p1 = scmp.lt.s32.totalorder %s16_s10, %s16_s10 }
   0x4   :  { %p193_p0 = scmp.ne.s32.totalorder %s16_s10, %s192_s13  ;;  %p198_p2 = scmp.lt.s32.totalorder %s192_s13, %s192_s13 }
   0x6   :  { %p199_p3 = por %p198_p2, %p197_p1 }
   0x8   :  { %p200_p4 = pnand %p199_p3, %p193_p0 }
   0xa   :  { %203 = shalt.err (!%p200_p4)
}
   0xb   :  { %18 = dma.hbm_to_vmem [thread:$0]  %s265_s0, 128, %s16_s10, [#allocation5]  }
   0xc   :  { %s212_s16 = scalar_lea.vmem %s26_s12, 128  ;;  %p217_p6 = scmp.lt.s32.totalorder %s26_s12, %s26_s12 }
   0xd   :  { %p213_p5 = scmp.ne.s32.totalorder %s26_s12, %s212_s16  ;;  %p218_p7 = scmp.lt.s32.totalorder %s212_s16, %s212_s16 }
   0xf   :  { %p219_p8 = por %p218_p7, %p217_p6 }
  0x11   :  { %p220_p9 = pnand %p219_p8, %p213_p5 }
  0x13   :  { %223 = shalt.err (!%p220_p9)
}
  0x14   :  { %28 = dma.hbm_to_vmem [thread:$0]  %s266_s1, 128, %s26_s12, [#allocation7]  }
  0x15   :  { %224 = dma.done.wait [#allocation5], 128  }
  0x16   :  { %225 = vsyncadd [#allocation5], 4294967168 }
  0x17   :  { %226 = dma.done.wait [#allocation7], 128  }
  0x18   :  { %227 = vsyncadd [#allocation7], 4294967168  ;;  %vm39_vm0 = vcmask 7168   ;;  %v230_v0 = vmov 0.0   ;;  %vm231_vm1 = vmmov 0   ;;  %vm44_vm2 = vcmask 261120  }
  0x19   :  { %41 = vst.msk [vmem:[#allocation3] sm:$0xff] %vm39_vm0, %v230_v0  ;;  %166 = vmatprep.subr.mxu0 %v230_v0  ;;  %168 = vmatprep.mubr.msk.f32.mxu0 %vm231_vm1, %v230_v0  ;;  %v42_v1 = vld [vmem:[#allocation6] sm:$0xff]  ;;  %v43_v2 = vld [vmem:[#allocation4] sm:$0xff]  ;;  %v232_v3 = vmov -inf   ;;  %vm122_vm3 = vcmask 64512   ;;  %v233_v7 = vmov 0  }
  0x1a   :  { %167 = vmatpush3.xpose.msk.msra.mxu0 %vm44_vm2, %v42_v1  ;;  %40 = vst.msk [vmem:[#allocation2] sm:$0xff] %vm39_vm0, %v232_v3  ;;  %177 = vset.pattern.permute.xlu0 %v233_v7 }
  0x1d   :  { %169 = vmatmul.mubr.msk.f32.vlgmr.msra.gmra.mxu0 %vm44_vm2, %v43_v2 }
  0x20   :  { %v130_v19 = vld [vmem:[#allocation3] sm:$0xff] }
  0x21   :  { %v121_v8 = vld [vmem:[#allocation2] sm:$0xff] }
  0xdd   :  { %v117_v4 = vpop.f32.mrf.mxu0 }
  0xde   :  { %v123_v5 = vsel %vm122_vm3, %v117_v4, -inf }
  0xdf   :  { %124 = vmax.xlane.f32.xlu0 %v123_v5  ;;  %v170_v6 = vpop.f32.mrf.mxu0 }
 0x168   :  { %v125_v9 = vpop.xlane.xlu0 %124 }
 0x169   :  { %v126_v10 = vmax.f32 %v121_v8, %v125_v9 }
 0x16b   :  { %v127_v11 = vsub.f32 %v121_v8, %v126_v10  ;;  %146 = vst.msk [vmem:[#allocation2] sm:$0xff] %vm39_vm0, %v126_v10  ;;  %134 = vperm.xlu0 %177, %v126_v10  }
 0x16d   :  { %v128_v17 = vmul.f32 1.442695, %v127_v11 }
 0x172   :  { %v153_v26 = vld [vmem:[#allocation2] sm:$0xff] }
 0x1e6   :  { %v135_v12 = vpop.permute.xlu0 %134 }
 0x1e7   :  { %v137_v13 = vsub.f32 %v117_v4, %v135_v12 }
 0x1e9   :  { %v138_v14 = vmul.f32 1.442695, %v137_v13 }
 0x1eb   :  { %178 = vpow2.f32 %v138_v14 }
 0x1ec   :  { %180 = vpow2.f32 %v128_v17 }
 0x1f8   :  { %v179_v15 = vpop.eup %178 }
 0x1f9   :  { %v140_v16 = vsel %vm122_vm3, %v179_v15, 0.0  ;;  %v181_v18 = vpop.eup %180 }
 0x1fa   :  { %141 = vadd.xlane.f32.xlu1 %v140_v16  ;;  %v131_v20 = vmul.f32 %v181_v18, %v130_v19 }
 0x283   :  { %v142_v21 = vpop.xlane.xlu1 %141 }
 0x284   :  { %v143_v22 = vadd.f32 %v142_v21, %v131_v20 }
 0x286   :  { %145 = vst.msk [vmem:[#allocation3] sm:$0xff] %vm39_vm0, %v143_v22 }
 0x28d   :  { %v150_v23 = vld [vmem:[#allocation3] sm:$0xff] }
 0x28e   :  { %182 = vlog2.f32 %v150_v23 }
 0x29b   :  { %v183_v24 = vpop.eup %182 }
 0x29c   :  { %v152_v25 = vmul.f32 0.6931472, %v183_v24 }
 0x29e   :  { %v154_v27 = vadd.f32 %v153_v26, %v152_v25 }
 0x2a0   :  { %155 = vst.msk [vmem:[%s267_s2] sm:$0xff] %vm39_vm0, %v154_v27 }
 0x2a1   :  { %160 = vsyncpa [#allocation5], 1 }
 0x2a2   :  { %161 = vsyncpa [#allocation7], 1 }

</bundles_post_ra>
